<compile_context>
chip_gen: v7x
topology: tpu7x:2x2x1
jax: 0.10.0
libtpu: 0.0.40
codegen_flags: <defaults>
</compile_context>

<pallas_src>
import jax
import jax.numpy as jnp
from jax.experimental import pallas as pl
from jax.experimental.pallas import tpu as pltpu

LANE = 128
SUBLANE = 8


def adaptor_mlp_kernel(x_ref,
                       w1_ref, b1_ref,
                       w2_ref, b2_ref,
                       w3_ref, b3_ref,
                       w4_ref, b4_ref,
                       o_ref):
    # Matmuls: bf16 operands, f32 accumulation (MXU).  Element-wise in f32.
    x = x_ref[...].astype(jnp.bfloat16)
    h = jnp.dot(x, w1_ref[...], preferred_element_type=jnp.float32)
    h = jnp.maximum(h + b1_ref[...], 0.0)
    h = jnp.dot(h.astype(jnp.bfloat16), w2_ref[...],
                preferred_element_type=jnp.float32)
    h = jnp.maximum(h + b2_ref[...], 0.0)
    h = jnp.dot(h.astype(jnp.bfloat16), w3_ref[...],
                preferred_element_type=jnp.float32)
    h = jnp.maximum(h + b3_ref[...], 0.0)
    h = jnp.dot(h.astype(jnp.bfloat16), w4_ref[...],
                preferred_element_type=jnp.float32)
    h = h + b4_ref[...]
    o_ref[...] = (jnp.tanh(h) * 2.0).astype(o_ref.dtype)


def _round_up(x, m):
    return ((x + m - 1) // m) * m


def adaptor_mlp_forward(adapt_obs, params, *, batch_tile=128):
    """adapt_obs: [B, adapt_dim] f32; params: dict of (W [in,out], b [1,out]) f32."""
    B, adapt_dim = adapt_obs.shape
    w1, b1 = params["w1"], params["b1"]
    w2, b2 = params["w2"], params["b2"]
    w3, b3 = params["w3"], params["b3"]
    w4, b4 = params["w4"], params["b4"]
    output_dim = w4.shape[1]

    # Lane-dense output: pad final layer out-width to a multiple of 128.
    out_pad = _round_up(max(output_dim, LANE), LANE)
    w4p = jnp.pad(w4, ((0, 0), (0, out_pad - output_dim)))
    b4p = jnp.pad(b4, ((0, 0), (0, out_pad - output_dim)))

    # bf16 weights for the MXU; biases stay f32 (added post-accumulation).
    w1b = w1.astype(jnp.bfloat16)
    w2b = w2.astype(jnp.bfloat16)
    w3b = w3.astype(jnp.bfloat16)
    w4b = w4p.astype(jnp.bfloat16)

    # Batch tiling: single step for small batches, big tiles otherwise.
    if B <= batch_tile:
        tile = _round_up(max(B, 1), SUBLANE)
    else:
        tile = batch_tile
    padded_b = _round_up(B, tile)
    x = adapt_obs
    if padded_b != B:
        x = jnp.pad(x, ((0, padded_b - B), (0, 0)))
    grid = (padded_b // tile,)

    # Whole-array, grid-invariant VMEM residency for the small weights/biases
    # (no pipelining / no second buffer copy).
    vmem_spec = pl.BlockSpec(memory_space=pltpu.MemorySpace.VMEM)

    out = pl.pallas_call(
        adaptor_mlp_kernel,
        out_shape=jax.ShapeDtypeStruct((padded_b, out_pad), jnp.float32),
        grid_spec=pltpu.PrefetchScalarGridSpec(
            num_scalar_prefetch=0,
            grid=grid,
            in_specs=[
                pl.BlockSpec((tile, adapt_dim), lambda i: (i, 0)),
                vmem_spec, vmem_spec,   # w1, b1
                vmem_spec, vmem_spec,   # w2, b2
                vmem_spec, vmem_spec,   # w3, b3
                vmem_spec, vmem_spec,   # w4, b4
            ],
            out_specs=pl.BlockSpec((tile, out_pad), lambda i: (i, 0)),
        ),
        compiler_params=pltpu.CompilerParams(
            dimension_semantics=("parallel",),
        ),
    )(x, w1b, b1, w2b, b2, w3b, b3, w4b, b4p)

    # Drop padded rows / padded output lanes.
    return out[:B, :output_dim]


def init_params(key, adapt_dim, output_dim):
    """PyTorch nn.Linear-style init (U[-1/sqrt(fan_in), 1/sqrt(fan_in)]).

    Weights stored transposed as [in_features, out_features]."""
    dims = [adapt_dim, 256, 128, 64, output_dim]
    params = {}
    keys = jax.random.split(key, 2 * (len(dims) - 1))
    for layer in range(len(dims) - 1):
        fan_in, fan_out = dims[layer], dims[layer + 1]
        bound = 1.0 / jnp.sqrt(jnp.float32(fan_in))
        wk, bk = keys[2 * layer], keys[2 * layer + 1]
        params[f"w{layer + 1}"] = jax.random.uniform(
            wk, (fan_in, fan_out), jnp.float32, minval=-bound, maxval=bound)
        params[f"b{layer + 1}"] = jax.random.uniform(
            bk, (1, fan_out), jnp.float32, minval=-bound, maxval=bound)
    return params


def reference_forward(adapt_obs, params, *, matmul_dtype=jnp.float32):
    """Plain-JAX reference.  matmul_dtype=bf16 mirrors the kernel's casts."""
    h = adapt_obs
    for layer in range(1, 5):
        w = params[f"w{layer}"].astype(matmul_dtype)
        h = jnp.dot(h.astype(matmul_dtype), w,
                    preferred_element_type=jnp.float32) + params[f"b{layer}"]
        if layer < 4:
            h = jnp.maximum(h, 0.0)
    return jnp.tanh(h) * 2.0


if __name__ == "__main__":
    adapt_dim = 32
    horizon = 8        # unused in forward (only part of the torch __init__)
    output_dim = 4
    batch = 16

    key = jax.random.PRNGKey(0)
    pkey, xkey, xkey2 = jax.random.split(key, 3)
    params = init_params(pkey, adapt_dim, output_dim)

    # Small batch: single grid step path.
    adapt_obs = jax.random.normal(xkey, (batch, adapt_dim), jnp.float32)
    out = adaptor_mlp_forward(adapt_obs, params)
    out = jax.block_until_ready(out)
    assert out.shape == (batch, output_dim)

    ref_bf16 = reference_forward(adapt_obs, params, matmul_dtype=jnp.bfloat16)
    ref_f32 = reference_forward(adapt_obs, params, matmul_dtype=jnp.float32)
    assert jnp.allclose(out, ref_bf16, atol=2e-3, rtol=2e-3), \
        "mismatch vs bf16-matched reference"
    assert jnp.allclose(out, ref_f32, atol=1e-1, rtol=1e-1), \
        "mismatch vs f32 reference (beyond bf16 quantization budget)"

    # Larger, non-divisible batch: exercises padding + multi-step parallel grid.
    big_batch = 300
    adapt_obs_big = jax.random.normal(xkey2, (big_batch, adapt_dim), jnp.float32)
    out_big = adaptor_mlp_forward(adapt_obs_big, params, batch_tile=128)
    out_big = jax.block_until_ready(out_big)
    assert out_big.shape == (big_batch, output_dim)
    ref_big = reference_forward(adapt_obs_big, params, matmul_dtype=jnp.bfloat16)
    assert jnp.allclose(out_big, ref_big, atol=2e-3, rtol=2e-3), \
        "mismatch vs reference on padded/tiled batch"

    print("KERNEL_OK")
</pallas_src>

<mosaic_0001>
module attributes {stable_mosaic.version = 11 : i64} {
  func.func @adaptor_mlp_kernel(%arg0: i32, %arg1: memref<16x32xf32, #tpu.memory_space<vmem>>, %arg2: memref<32x256xbf16, #tpu.memory_space<vmem>>, %arg3: memref<1x256xf32, #tpu.memory_space<vmem>>, %arg4: memref<256x128xbf16, #tpu.memory_space<vmem>>, %arg5: memref<1x128xf32, #tpu.memory_space<vmem>>, %arg6: memref<128x64xbf16, #tpu.memory_space<vmem>>, %arg7: memref<1x64xf32, #tpu.memory_space<vmem>>, %arg8: memref<64x128xbf16, #tpu.memory_space<vmem>>, %arg9: memref<1x128xf32, #tpu.memory_space<vmem>>, %arg10: memref<16x128xf32, #tpu.memory_space<vmem>>) attributes {dimension_semantics = [#tpu.dimension_semantics<parallel>], iteration_bounds = array<i64: 1>, scalar_prefetch = 0 : i64, scratch_operands = 0 : i64, tpu.core_type = #tpu.core_type<tc>, window_params = [{transform_indices = @transform_0, window_bounds = array<i64: 16, 32>}, {pipeline_mode = #tpu.pipeline_mode<synchronous>, transform_indices = @transform_1, window_bounds = array<i64: 32, 256>}, {pipeline_mode = #tpu.pipeline_mode<synchronous>, transform_indices = @transform_2, window_bounds = array<i64: 1, 256>}, {pipeline_mode = #tpu.pipeline_mode<synchronous>, transform_indices = @transform_3, window_bounds = array<i64: 256, 128>}, {pipeline_mode = #tpu.pipeline_mode<synchronous>, transform_indices = @transform_4, window_bounds = array<i64: 1, 128>}, {pipeline_mode = #tpu.pipeline_mode<synchronous>, transform_indices = @transform_5, window_bounds = array<i64: 128, 64>}, {pipeline_mode = #tpu.pipeline_mode<synchronous>, transform_indices = @transform_6, window_bounds = array<i64: 1, 64>}, {pipeline_mode = #tpu.pipeline_mode<synchronous>, transform_indices = @transform_7, window_bounds = array<i64: 64, 128>}, {pipeline_mode = #tpu.pipeline_mode<synchronous>, transform_indices = @transform_8, window_bounds = array<i64: 1, 128>}, {transform_indices = @transform_9, window_bounds = array<i64: 16, 128>}]} {
    %c0 = arith.constant 0 : index
    %c0_0 = arith.constant 0 : index
    %0 = vector.load %arg1[%c0, %c0_0] : memref<16x32xf32, #tpu.memory_space<vmem>>, vector<16x32xf32>
    %1 = arith.truncf %0 : vector<16x32xf32> to vector<16x32xbf16>
    %c0_1 = arith.constant 0 : index
    %c0_2 = arith.constant 0 : index
    %2 = vector.load %arg2[%c0_1, %c0_2] : memref<32x256xbf16, #tpu.memory_space<vmem>>, vector<32x256xbf16>
    %cst = arith.constant dense<0.000000e+00> : vector<16x256xf32>
    %3 = tpu.matmul %1, %2, %cst {dimension_numbers = #tpu.dot_dimension_numbers<[1], [0], [0], [1], [0, 0, 1, 1], [], []>} : vector<16x32xbf16>, vector<32x256xbf16>, vector<16x256xf32> -> vector<16x256xf32>
    %c0_3 = arith.constant 0 : index
    %c0_4 = arith.constant 0 : index
    %4 = vector.load %arg3[%c0_3, %c0_4] : memref<1x256xf32, #tpu.memory_space<vmem>>, vector<1x256xf32>
    %5 = vector.broadcast %4 : vector<1x256xf32> to vector<16x256xf32>
    %6 = arith.addf %3, %5 : vector<16x256xf32>
    %cst_5 = arith.constant 0.000000e+00 : f32
    %7 = vector.broadcast %cst_5 : f32 to vector<16x256xf32>
    %8 = arith.maximumf %6, %7 : vector<16x256xf32>
    %9 = arith.truncf %8 : vector<16x256xf32> to vector<16x256xbf16>
    %c0_6 = arith.constant 0 : index
    %c0_7 = arith.constant 0 : index
    %10 = vector.load %arg4[%c0_6, %c0_7] : memref<256x128xbf16, #tpu.memory_space<vmem>>, vector<256x128xbf16>
    %cst_8 = arith.constant dense<0.000000e+00> : vector<16x128xf32>
    %11 = tpu.matmul %9, %10, %cst_8 {dimension_numbers = #tpu.dot_dimension_numbers<[1], [0], [0], [1], [0, 0, 1, 1], [], []>} : vector<16x256xbf16>, vector<256x128xbf16>, vector<16x128xf32> -> vector<16x128xf32>
    %c0_9 = arith.constant 0 : index
    %c0_10 = arith.constant 0 : index
    %12 = vector.load %arg5[%c0_9, %c0_10] : memref<1x128xf32, #tpu.memory_space<vmem>>, vector<1x128xf32>
    %13 = vector.broadcast %12 : vector<1x128xf32> to vector<16x128xf32>
    %14 = arith.addf %11, %13 : vector<16x128xf32>
    %cst_11 = arith.constant 0.000000e+00 : f32
    %15 = vector.broadcast %cst_11 : f32 to vector<16x128xf32>
    %16 = arith.maximumf %14, %15 : vector<16x128xf32>
    %17 = arith.truncf %16 : vector<16x128xf32> to vector<16x128xbf16>
    %c0_12 = arith.constant 0 : index
    %c0_13 = arith.constant 0 : index
    %18 = vector.load %arg6[%c0_12, %c0_13] : memref<128x64xbf16, #tpu.memory_space<vmem>>, vector<128x64xbf16>
    %cst_14 = arith.constant dense<0.000000e+00> : vector<16x64xf32>
    %19 = tpu.matmul %17, %18, %cst_14 {dimension_numbers = #tpu.dot_dimension_numbers<[1], [0], [0], [1], [0, 0, 1, 1], [], []>} : vector<16x128xbf16>, vector<128x64xbf16>, vector<16x64xf32> -> vector<16x64xf32>
    %c0_15 = arith.constant 0 : index
    %c0_16 = arith.constant 0 : index
    %20 = vector.load %arg7[%c0_15, %c0_16] : memref<1x64xf32, #tpu.memory_space<vmem>>, vector<1x64xf32>
    %21 = vector.broadcast %20 : vector<1x64xf32> to vector<16x64xf32>
    %22 = arith.addf %19, %21 : vector<16x64xf32>
    %cst_17 = arith.constant 0.000000e+00 : f32
    %23 = vector.broadcast %cst_17 : f32 to vector<16x64xf32>
    %24 = arith.maximumf %22, %23 : vector<16x64xf32>
    %25 = arith.truncf %24 : vector<16x64xf32> to vector<16x64xbf16>
    %c0_18 = arith.constant 0 : index
    %c0_19 = arith.constant 0 : index
    %26 = vector.load %arg8[%c0_18, %c0_19] : memref<64x128xbf16, #tpu.memory_space<vmem>>, vector<64x128xbf16>
    %cst_20 = arith.constant dense<0.000000e+00> : vector<16x128xf32>
    %27 = tpu.matmul %25, %26, %cst_20 {dimension_numbers = #tpu.dot_dimension_numbers<[1], [0], [0], [1], [0, 0, 1, 1], [], []>} : vector<16x64xbf16>, vector<64x128xbf16>, vector<16x128xf32> -> vector<16x128xf32>
    %c0_21 = arith.constant 0 : index
    %c0_22 = arith.constant 0 : index
    %28 = vector.load %arg9[%c0_21, %c0_22] : memref<1x128xf32, #tpu.memory_space<vmem>>, vector<1x128xf32>
    %29 = vector.broadcast %28 : vector<1x128xf32> to vector<16x128xf32>
    %30 = arith.addf %27, %29 : vector<16x128xf32>
    %31 = math.tanh %30 : vector<16x128xf32>
    %cst_23 = arith.constant 2.000000e+00 : f32
    %32 = vector.broadcast %cst_23 : f32 to vector<16x128xf32>
    %33 = arith.mulf %31, %32 : vector<16x128xf32>
    %c0_24 = arith.constant 0 : index
    %c0_25 = arith.constant 0 : index
    %34 = vector.load %arg10[%c0_24, %c0_25] : memref<16x128xf32, #tpu.memory_space<vmem>>, vector<16x128xf32>
    tpu.vector_store %arg10[%c0_24, %c0_25], %33 {strides = array<i32>} : memref<16x128xf32, #tpu.memory_space<vmem>>, vector<16x128xf32>,
    return
  }
  func.func @transform_0(%arg0: i32) -> (i32, i32) {
    %c0_i32 = arith.constant 0 : i32
    %c0_i32_0 = arith.constant 0 : i32
    return %arg0, %c0_i32 : i32, i32
  }
  func.func @transform_1(%arg0: i32) -> (i32, i32) {
    %c0_i32 = arith.constant 0 : i32
    %c0_i32_0 = arith.constant 0 : i32
    %c0_i32_1 = arith.constant 0 : i32
    return %c0_i32, %c0_i32_0 : i32, i32
  }
  func.func @transform_2(%arg0: i32) -> (i32, i32) {
    %c0_i32 = arith.constant 0 : i32
    %c0_i32_0 = arith.constant 0 : i32
    %c0_i32_1 = arith.constant 0 : i32
    return %c0_i32, %c0_i32_0 : i32, i32
  }
  func.func @transform_3(%arg0: i32) -> (i32, i32) {
    %c0_i32 = arith.constant 0 : i32
    %c0_i32_0 = arith.constant 0 : i32
    %c0_i32_1 = arith.constant 0 : i32
    return %c0_i32, %c0_i32_0 : i32, i32
  }
  func.func @transform_4(%arg0: i32) -> (i32, i32) {
    %c0_i32 = arith.constant 0 : i32
    %c0_i32_0 = arith.constant 0 : i32
    %c0_i32_1 = arith.constant 0 : i32
    return %c0_i32, %c0_i32_0 : i32, i32
  }
  func.func @transform_5(%arg0: i32) -> (i32, i32) {
    %c0_i32 = arith.constant 0 : i32
    %c0_i32_0 = arith.constant 0 : i32
    %c0_i32_1 = arith.constant 0 : i32
    return %c0_i32, %c0_i32_0 : i32, i32
  }
  func.func @transform_6(%arg0: i32) -> (i32, i32) {
    %c0_i32 = arith.constant 0 : i32
    %c0_i32_0 = arith.constant 0 : i32
    %c0_i32_1 = arith.constant 0 : i32
    return %c0_i32, %c0_i32_0 : i32, i32
  }
  func.func @transform_7(%arg0: i32) -> (i32, i32) {
    %c0_i32 = arith.constant 0 : i32
    %c0_i32_0 = arith.constant 0 : i32
    %c0_i32_1 = arith.constant 0 : i32
    return %c0_i32, %c0_i32_0 : i32, i32
  }
  func.func @transform_8(%arg0: i32) -> (i32, i32) {
    %c0_i32 = arith.constant 0 : i32
    %c0_i32_0 = arith.constant 0 : i32
    %c0_i32_1 = arith.constant 0 : i32
    return %c0_i32, %c0_i32_0 : i32, i32
  }
  func.func @transform_9(%arg0: i32) -> (i32, i32) {
    %c0_i32 = arith.constant 0 : i32
    %c0_i32_0 = arith.constant 0 : i32
    return %arg0, %c0_i32 : i32, i32
  }
}

</mosaic_0001>

<bundles_post_ra>
// kernel: tpu_custom_call.1
= control target key start
LH: loop header
LB: loop body
LE: loop exit
PB: predicated region body
PF: predicated region fallthrough
CT: control target
= control target key end

     0   :  { %14 = vsyncpa [#allocation3], 0  ;;  %s904_s0 = inlined_call_operand.vmem [shape: f32[16,32], index: 0, kind: input, shape index: {}]   ;;  %s905_s1 = inlined_call_operand.vmem [shape: bf16[32,256], index: 1, kind: input, shape index: {}]   ;;  %s906_s2 = inlined_call_operand.vmem [shape: f32[1,256], index: 2, kind: input, shape index: {}]   ;;  %s907_s3 = inlined_call_operand.hbm [shape: bf16[256,128], index: 3, kind: input, shape index: {}]   ;;  %s908_s4 = inlined_call_operand.vmem [shape: f32[1,128], index: 4, kind: input, shape index: {}]   ;;  %s909_s5 = inlined_call_operand.vmem [shape: bf16[128,64], index: 5, kind: input, shape index: {}]   ;;  %s910_s6 = inlined_call_operand.vmem [shape: f32[1,64], index: 6, kind: input, shape index: {}]   ;;  %s911_s7 = inlined_call_operand.vmem [shape: bf16[64,128], index: 7, kind: input, shape index: {}]   ;;  %s912_s8 = inlined_call_operand.vmem [shape: f32[1,128], index: 8, kind: input, shape index: {}]   ;;  %s913_s9 = inlined_call_operand.hbm [shape: f32[16,128], index: 9, kind: output, shape index: {}]  }
   0x1   :  { %15 = vsyncpa [#allocation4], 0  ;;  %s741_s30 = smov [#allocation2]   ;;  %s693_s13 = scalar_lea.hbm %s907_s3, 2048 }
   0x2   :  { %s27_s10 = sshll.u32 %s741_s30, 4  ;;  %p694_p0 = scmp.ne.s32.totalorder %s907_s3, %s693_s13  ;;  %s28_s10 = int_to_ptr.vmem [resolvable:$true] %s27_s10 }
   0x3   :  { %p697_p1 = scmp.lt.u32.totalorder %s693_s13, %s907_s3 }
   0x5   :  { %p699_p2 = pnand %p697_p1, %p694_p0 }
   0x7   :  { %702 = shalt.err (!%p699_p2)
}
   0x8   :  { %s703_s18 = scalar_lea.vmem %s28_s10, 2048  ;;  %p708_p4 = scmp.lt.s32.totalorder %s28_s10, %s28_s10 }
   0x9   :  { %p704_p3 = scmp.ne.s32.totalorder %s28_s10, %s703_s18  ;;  %p709_p5 = scmp.lt.s32.totalorder %s703_s18, %s703_s18 }
   0xb   :  { %p710_p6 = por %p709_p5, %p708_p4 }
   0xd   :  { %p711_p7 = pnand %p710_p6, %p704_p3 }
   0xf   :  { %714 = shalt.err (!%p711_p7)
}
  0x10   :  { %s742_s19 = smov 64   ;;  %s743_s20 = smov 4  }
  0x11   :  { %33 = dma.hbm_to_vmem [thread:$0]  %s907_s3, 2048, %s28_s10, [#allocation3], %s742_s19, %s742_s19, %s743_s20  }
  0x12   :  { %737 = dma.done.wait [#allocation3], 2048  }
  0x13   :  { %738 = vsyncadd [#allocation3], 4294965248  ;;  %v744_v0 = vmov 0   ;;  %v655_v1 = vld [vmem:[%s905_s1 + $0x4] ss:$8 sps:$4 sm:$0xff]   ;;  %vm87_vm0 = vcmask 261120   ;;  %v57_v30 = vlaneseq }
  0x14   :  { %123 = vmatprep.mubr.bf16.mxu0 %v744_v0  ;;  %v657_v2 = vld [vmem:[%s905_s1] ss:$8 sps:$4 sm:$0xff]   ;;  %91 = vmatprep.subr.bf16.mxu0 %v655_v1  ;;  %v658_v3 = vld [vmem:[%s905_s1 + $0x14] ss:$8 sps:$4 sm:$0xff]   ;;  %v660_v4 = vld [vmem:[%s905_s1 + $0x10] ss:$8 sps:$4 sm:$0xff]  }
  0x15   :  { %v48_v5 = vld [vmem:[%s904_s0] sm:$0xff]  ;;  %92 = vmatpush1.bf16.msra.mxu0 %v657_v2  ;;  %v49_v6 = vld [vmem:[%s904_s0 + $0x8] sm:$0xff]  ;;  %v665_v12 = vld [vmem:[#allocation2 + $0x50] sm:$0xff]   ;;  %v745_v25 = vmov 0.0   ;;  %v58_v31 = vshrl.u32 %v57_v30, 7  ;;  %vm746_vm1 = vmmov 0  }
  0x16   :  { %93 = vmatprep.subr.bf16.mxu0 %v658_v3  ;;  %v661_v7 = vld [vmem:[#allocation2 + $0x40] sm:$0xff]   ;;  %v50_v9 = vpack.c.bf16 %v49_v6, %v48_v5  ;;  %v663_v10 = vld [vmem:[#allocation2 + $0x48] sm:$0xff]   ;;  %v666_v13 = vld [vmem:[#allocation2 + $0x10] sm:$0xff]   ;;  %vm473_vm2 = vcmask 523264  }
  0x17   :  { %v662_v8 = vld [vmem:[#allocation2] sm:$0xff]   ;;  %578 = vmatprep.subr.bf16.mxu1 %v661_v7  ;;  %v664_v11 = vld [vmem:[#allocation2 + $0x8] sm:$0xff]   ;;  %v667_v14 = vld [vmem:[#allocation2 + $0x58] sm:$0xff]   ;;  %v59_v32 = vsub.s32 0, %v58_v31  ;;  %v63_v34 = vsub.s32 1, %v58_v31 }
  0x18   :  { %579 = vmatpush3.bf16.msra.mxu1 %v662_v8  ;;  %v668_v15 = vld [vmem:[#allocation2 + $0x18] sm:$0xff]   ;;  %v669_v16 = vld [vmem:[#allocation2 + $0x60] sm:$0xff]   ;;  %v671_v18 = vld [vmem:[#allocation2 + $0x68] sm:$0xff]  }
  0x19   :  { %94 = vmatpush1.bf16.msra.mxu0 %v660_v4  ;;  %580 = vmatprep.subr.bf16.mxu1 %v663_v10  ;;  %v670_v17 = vld [vmem:[#allocation2 + $0x20] sm:$0xff]   ;;  %v672_v19 = vld [vmem:[#allocation2 + $0x28] sm:$0xff]   ;;  %v673_v20 = vld [vmem:[#allocation2 + $0x70] sm:$0xff]  }
  0x1a   :  { %v674_v21 = vld [vmem:[#allocation2 + $0x30] sm:$0xff]   ;;  %v675_v22 = vld [vmem:[#allocation2 + $0x78] sm:$0xff]   ;;  %v677_v24 = vld [vmem:[%s909_s5] sm:$0xff]   ;;  %614 = vmatprep.subr.bf16.mxu0 %v745_v25 }
  0x1b   :  { %v676_v23 = vld [vmem:[#allocation2 + $0x38] sm:$0xff]   ;;  %v678_v26 = vld [vmem:[%s909_s5 + $0x8] sm:$0xff]   ;;  %v679_v27 = vld [vmem:[%s909_s5 + $0x10] sm:$0xff]  }
  0x1c   :  { %545 = vmatmul.mubr.msk.bf16.vlgmr.msra.gmra.mrb[0].mxu0 %vm87_vm0, %v50_v9  ;;  %581 = vmatpush3.bf16.msra.mxu1 %v664_v11  ;;  %v680_v28 = vld [vmem:[%s909_s5 + $0x18] sm:$0xff]   ;;  %v681_v29 = vld [vmem:[%s909_s5 + $0x20] sm:$0xff]   ;;  %v682_v51 = vld [vmem:[%s909_s5 + $0x28] sm:$0xff]  }
  0x1d   :  { %582 = vmatprep.subr.bf16.mxu1 %v665_v12  ;;  %615 = vmatpush3.bf16.msra.mxu0 %v677_v24  ;;  %v55_v33 = vld [vmem:[%s906_s2] sm:$0x3]  ;;  %v683_v52 = vld [vmem:[%s909_s5 + $0x30] sm:$0xff]   ;;  %v684_v53 = vld [vmem:[%s909_s5 + $0x38] sm:$0xff]  }
  0x1e   :  { %616 = vmatprep.subr.bf16.mxu0 %v745_v25  ;;  %v60_v35 = vrot.slane %v55_v33, %v59_v32  ;;  %v64_v36 = vrot.slane %v55_v33, %v63_v34  ;;  %630 = vmatprep.mubr.msk.bf16.mxu0 %vm746_vm1, %v745_v25  ;;  %v685_v54 = vld [vmem:[%s911_s7] sm:$0xff]   ;;  %v686_v55 = vld [vmem:[%s911_s7 + $0x8] sm:$0xff]   ;;  %v687_v4 = vld [vmem:[%s911_s7 + $0x10] sm:$0xff]  }
  0x1f   :  { %v546_v57 = vld [vmem:[%s908_s4] ss:$0 sm:$0xff]  ;;  %v688_v5 = vld [vmem:[%s911_s7 + $0x18] sm:$0xff]  }
  0x20   :  { %583 = vmatpush3.bf16.msra.mxu1 %v666_v13  ;;  %v563_v6 = vld [vmem:[%s910_s6] ss:$0 sm:$0xff]  ;;  %s747_s6 = smov [#allocation5]  }
  0x21   :  { %584 = vmatprep.subr.bf16.mxu1 %v667_v14  ;;  %617 = vmatpush3.bf16.msra.mxu0 %v678_v26  ;;  %s529_s7 = sshll.u32 %s747_s6, 4  ;;  %s530_s7 = int_to_ptr.vmem [resolvable:$true] %s529_s7 }
  0x22   :  { %618 = vmatprep.subr.bf16.mxu0 %v745_v25  ;;  %s715_s16 = scalar_lea.vmem %s530_s7, 256  ;;  %p720_p9 = scmp.lt.s32.totalorder %s530_s7, %s530_s7 }
  0x23   :  { %p716_p8 = scmp.ne.s32.totalorder %s530_s7, %s715_s16  ;;  %p721_p10 = scmp.lt.s32.totalorder %s715_s16, %s715_s16 }
  0x24   :  { %585 = vmatpush3.bf16.msra.mxu1 %v668_v15 }
  0x25   :  { %586 = vmatprep.subr.bf16.mxu1 %v669_v16  ;;  %619 = vmatpush3.bf16.msra.mxu0 %v679_v27  ;;  %v572_v16 = vld [vmem:[%s912_s8] ss:$0 sm:$0xff]  ;;  %p722_p11 = por %p721_p10, %p720_p9 }
  0x26   :  { %620 = vmatprep.subr.bf16.mxu0 %v745_v25 }
  0x27   :  { %p723_p12 = pnand %p722_p11, %p716_p8 }
  0x28   :  { %587 = vmatpush3.bf16.msra.mxu1 %v670_v17 }
  0x29   :  { %588 = vmatprep.subr.bf16.mxu1 %v671_v18  ;;  %621 = vmatpush3.bf16.msra.mxu0 %v680_v28 }
  0x2a   :  { %622 = vmatprep.subr.bf16.mxu0 %v745_v25 }
  0x2c   :  { %589 = vmatpush3.bf16.msra.mxu1 %v672_v19 }
  0x2d   :  { %590 = vmatprep.subr.bf16.mxu1 %v673_v20  ;;  %623 = vmatpush3.bf16.msra.mxu0 %v681_v29 }
  0x2e   :  { %624 = vmatprep.subr.bf16.mxu0 %v745_v25 }
  0x30   :  { %591 = vmatpush3.bf16.msra.mxu1 %v674_v21 }
  0x31   :  { %592 = vmatprep.subr.bf16.mxu1 %v675_v22  ;;  %625 = vmatpush3.bf16.msra.mxu0 %v682_v51 }
  0x32   :  { %626 = vmatprep.subr.bf16.mxu0 %v745_v25 }
  0x34   :  { %593 = vmatpush3.bf16.msra.mxu1 %v676_v23 }
  0x35   :  { %634 = vmatprep.subr.bf16.mxu1 %v745_v25  ;;  %627 = vmatpush3.bf16.msra.mxu0 %v683_v52 }
  0x36   :  { %628 = vmatprep.subr.bf16.mxu0 %v745_v25 }
  0x39   :  { %629 = vmatpush3.bf16.msra.mxu0 %v684_v53 }
  0xef   :  { %v125_v37 = vpop.f32.mrb[0].mxu0 }
  0xf0   :  { %v126_v38 = vadd.f32 %v125_v37, %v60_v35  ;;  %v127_v39 = vpop.f32.mrb[1].mxu0 }
  0xf1   :  { %v128_v40 = vadd.f32 %v127_v39, %v64_v36  ;;  %v129_v41 = vpop.f32.mrb[2].mxu0 }
  0xf2   :  { %v130_v42 = vadd.f32 %v129_v41, %v60_v35  ;;  %v131_v43 = vpop.f32.mrb[3].mxu0  ;;  %v134_v45 = vmax.f32 %v126_v38, 0.0 }
  0xf3   :  { %v132_v44 = vadd.f32 %v131_v43, %v64_v36  ;;  %v135_v47 = vmax.f32 %v128_v40, 0.0 }
  0xf4   :  { %v136_v46 = vmax.f32 %v130_v42, 0.0 }
  0xf5   :  { %v137_v48 = vmax.f32 %v132_v44, 0.0 }
  0xf6   :  { %v138_v49 = vpack.c.bf16 %v136_v46, %v134_v45 }
  0xf7   :  { %v139_v50 = vpack.c.bf16 %v137_v48, %v135_v47 }
  0xf9   :  { %307 = vmatprep.mubr.bf16.mxu1 %v139_v50 }
  0xfa   :  { %308 = vmatmul.mubr.bf16.vlgmr.msra.gmra.mrb[0].mxu1 %v138_v49 }
  0xfb   :  { %642 = vmatprep.mubr.msk.bf16.mxu1 %vm746_vm1, %v745_v25  ;;  %635 = vmatpush3.bf16.msra.mxu1 %v685_v54 }
  0xfc   :  { %636 = vmatprep.subr.bf16.mxu1 %v745_v25 }
  0xff   :  { %637 = vmatpush3.bf16.msra.mxu1 %v686_v55 }
 0x100   :  { %638 = vmatprep.subr.bf16.mxu1 %v745_v25 }
 0x103   :  { %639 = vmatpush3.bf16.msra.mxu1 %v687_v4 }
 0x104   :  { %640 = vmatprep.subr.bf16.mxu1 %v745_v25 }
 0x107   :  { %641 = vmatpush3.bf16.msra.mxu1 %v688_v5 }
 0x1cd   :  { %v594_v56 = vpop.f32.mrb[0].mxu1 }
 0x1ce   :  { %v595_v58 = vpop.f32.mrb[1].mxu1 }
 0x1cf   :  { %v596_v59 = vadd.f32 %v595_v58, %v594_v56  ;;  %v597_v60 = vpop.f32.mrb[2].mxu1 }
 0x1d0   :  { %v598_v61 = vpop.f32.mrb[3].mxu1 }
 0x1d1   :  { %v310_v62 = vadd.f32 %v596_v59, %v546_v57  ;;  %v599_v63 = vadd.f32 %v598_v61, %v597_v60 }
 0x1d3   :  { %v313_v0 = vadd.f32 %v599_v63, %v546_v57  ;;  %v316_v1 = vmax.f32 %v310_v62, 0.0 }
 0x1d5   :  { %v317_v2 = vmax.f32 %v313_v0, 0.0 }
 0x1d7   :  { %v318_v3 = vpack.c.bf16 %v317_v2, %v316_v1 }
 0x1d9   :  { %631 = vmatmul.mubr.bf16.vlgmr.msra.gmra.mrb[4].mxu0 %v318_v3 }
 0x2ac   :  { %v424_v7 = vpop.f32.mrb[4].mxu0 }
 0x2ad   :  { %v425_v8 = vadd.f32 %v563_v6, %v424_v7  ;;  %v632_v9 = vpop.f32.mrb[5].mxu0 }
 0x2ae   :  { %v427_v10 = vpop.f32.mrb[6].mxu0 }
 0x2af   :  { %v428_v11 = vadd.f32 %v563_v6, %v427_v10  ;;  %v633_v12 = vpop.f32.mrb[7].mxu0  ;;  %v431_v13 = vmax.f32 %v425_v8, 0.0 }
 0x2b1   :  { %v432_v14 = vmax.f32 %v428_v11, 0.0 }
 0x2b3   :  { %v433_v15 = vpack.c.bf16 %v432_v14, %v431_v13 }
 0x2b5   :  { %643 = vmatmul.mubr.msk.bf16.vlgmr.msra.gmra.mrb[4].mxu1 %vm473_vm2, %v433_v15 }
 0x388   :  { %v511_v17 = vpop.f32.mrb[4].mxu1 }
 0x389   :  { %v512_v18 = vadd.f32 %v572_v16, %v511_v17  ;;  %v644_v19 = vpop.f32.mrb[5].mxu1 }
 0x38a   :  { %v514_v20 = vpop.f32.mrb[6].mxu1 }
 0x38b   :  { %689 = vtanh.f32 %v512_v18  ;;  %v515_v21 = vadd.f32 %v572_v16, %v514_v20  ;;  %v645_v22 = vpop.f32.mrb[7].mxu1 }
 0x38d   :  { %691 = vtanh.f32 %v515_v21 }
 0x395   :  { %v690_v23 = vpop.eup %689 }
 0x396   :  { %v520_v24 = vmul.f32 2.0, %v690_v23 }
 0x397   :  { %v692_v25 = vpop.eup %691 }
 0x398   :  { %522 = vst [vmem:[#allocation5] sm:$0xff] %v520_v24  ;;  %v521_v26 = vmul.f32 2.0, %v692_v25 }
 0x39a   :  { %523 = vst [vmem:[#allocation5 + $0x8] sm:$0xff] %v521_v26 }
 0x39b   :  { %726 = shalt.err (!%p723_p12)
}
 0x39c   :  { %s727_s18 = scalar_lea.hbm %s913_s9, 256 }
 0x39d   :  { %p728_p13 = scmp.ne.s32.totalorder %s913_s9, %s727_s18  ;;  %p731_p0 = scmp.lt.u32.totalorder %s727_s18, %s913_s9 }
 0x39f   :  { %p733_p1 = pnand %p731_p0, %p728_p13 }
 0x3a1   :  { %736 = shalt.err (!%p733_p1)
}
 0x3a2   :  { %s748_s2 = smov 128   ;;  %s749_s23 = smov 8  }
 0x3a3   :  { %535 = dma.vmem_to_hbm [thread:$0]  %s530_s7, 256, %s913_s9, [#allocation4], %s748_s2, %s748_s2, %s749_s23  }
 0x3a4   :  { %739 = dma.done.wait [#allocation4], 256  }
 0x3a5   :  { %740 = vsyncadd [#allocation4], 4294967040 }
 0x3a6   :  { %539 = vsyncpa [#allocation3], 1 }
 0x3a7   :  { %540 = vsyncpa [#allocation4], 1 }

</bundles_post_ra>
